<compile_context>
chip_gen: v7x
topology: tpu7x:2x2x1
jax: 0.10.0
libtpu: 0.0.40
codegen_flags: <defaults>
</compile_context>

<pallas_src>
import math

import jax
import jax.numpy as jnp
from jax.experimental import pallas as pl
from jax.experimental.pallas import tpu as pltpu


def _round_up(x: int, m: int) -> int:
    return (x + m - 1) // m * m


def _make_kernel(num_bands, num_offsets, num_layers, pooling, compute_dtype,
                 in_features, f1p, fout_p):
    """Kernel specialized for (bands, offsets, layers, pooling, feature dims)."""

    def kernel(*refs):
        x_ref = refs[0]                                  # (R, B*F0)      f32
        w_refs = refs[1:1 + 2 * num_layers:2]            # per layer weights
        b_refs = refs[2:2 + 2 * num_layers:2]            # per layer biases (f32)
        o_ref = refs[1 + 2 * num_layers]                 # (R, B*Fout_p)  f32

        x_all = x_ref[...]                               # one dense load of the tile
        for band in range(num_bands):
            xb = x_all[:, band * in_features:(band + 1) * in_features]
            xb = xb.astype(compute_dtype)                # (R, F0)
            # Layer 0: roll folded into pre-rolled weights, offsets fused into
            # the N dim -> a single MXU op per band; x never duplicated.
            w0 = w_refs[0][band, :, :]                   # (F0, O*F1p)
            b0 = b_refs[0][band, :, :]                   # (1,  O*F1p) f32
            h1 = jnp.dot(xb, w0, preferred_element_type=jnp.float32) + b0
            h1 = jnp.maximum(h1, 0.0)                    # (R, O*F1p) f32

            pooled = None
            for off in range(num_offsets):
                h = h1[:, off * f1p:(off + 1) * f1p]     # 128-aligned lane slice
                for layer in range(1, num_layers):
                    w = w_refs[layer][band, :, :]        # (F_{l-1}p, F_lp)
                    b = b_refs[layer][band, :, :]        # (1, F_lp) f32
                    h = jnp.dot(h.astype(compute_dtype), w,
                                preferred_element_type=jnp.float32)
                    h = jnp.maximum(h + b, 0.0)          # fused bias + ReLU
                if pooled is None:
                    pooled = h
                elif pooling == "max":
                    pooled = jnp.maximum(pooled, h)
                else:
                    pooled = pooled + h                  # mean: 1/O folded into last layer
            # Dense, 128-aligned lane-slice store (no masked vst.msk).
            o_ref[:, band * fout_p:(band + 1) * fout_p] = pooled.astype(o_ref.dtype)

    return kernel


def multiband_rotation_invariant_mlp(
    x,
    params,
    *,
    offsets=(-1, 0, 1),
    pooling="mean",
    tile_rows=2048,
    use_bf16=True,
):
    """x: (T, N, num_bands, C, ...) f32.
    params: list over bands; each band is a list of (W, b) per layer with
            W: (out_features, in_features) (PyTorch layout), b: (out_features,).
    Returns (T, N, num_bands, mlp_features[-1]) f32."""
    assert pooling in ("mean", "max")
    offsets = tuple(offsets) if len(offsets) > 0 else (0,)

    T, N, num_bands = int(x.shape[0]), int(x.shape[1]), int(x.shape[2])
    C = int(x.shape[3])
    trailing = 1
    for d in x.shape[4:]:
        trailing *= int(d)
    in_features = C * trailing
    num_offsets = len(offsets)
    num_layers = len(params[0])

    feat_dims = [in_features] + [int(params[0][l][0].shape[0]) for l in range(num_layers)]
    # Hidden/output feature dims zero-padded to lane-dense 128 multiples; the
    # input feature dim stays unpadded (no extra HBM bytes, MXU K-tile is free).
    feat_pad = [in_features] + [_round_up(f, 128) for f in feat_dims[1:]]
    f1, f1p = feat_dims[1], feat_pad[1]
    fout, fout_p = feat_dims[-1], feat_pad[-1]

    rows = T * N
    compute_dtype = jnp.bfloat16 if use_bf16 else jnp.float32

    # ---- wrapper glue: only weight prep (tiny); x is a free reshape ----
    x2 = x.reshape(rows, num_bands * in_features)        # natural layout, no copy

    # Fold mean-pool scale into the last layer (ReLU(x)*c == ReLU(x*c), c > 0).
    scale = (1.0 / num_offsets) if pooling == "mean" else 1.0

    w_inputs = []
    # Layer 0: roll folded into weights, offsets concatenated along out dim.
    l0_scale = scale if num_layers == 1 else 1.0
    w0_bands, b0_bands = [], []
    for b in range(num_bands):
        W, bias = params[b][0]
        W = W * l0_scale
        bias = bias * l0_scale
        parts = []
        for off in offsets:
            # roll(x, off, channel_dim) @ W.T == x @ roll(W, -off*trailing, in_axis).T
            Wr = jnp.roll(W, -off * trailing, axis=1).T          # (F0, F1)
            parts.append(jnp.pad(Wr, ((0, 0), (0, f1p - f1))))
        w0_bands.append(jnp.concatenate(parts, axis=1))          # (F0, O*F1p)
        bp = jnp.pad(bias, (0, f1p - f1))
        b0_bands.append(jnp.tile(bp, (num_offsets,)))            # (O*F1p,)
    w_inputs.append(jnp.stack(w0_bands, axis=0).astype(compute_dtype))
    w_inputs.append(jnp.stack(b0_bands, axis=0)
                    .reshape(num_bands, 1, num_offsets * f1p).astype(jnp.float32))

    for l in range(1, num_layers):
        fi, fo = feat_dims[l], feat_dims[l + 1]
        fip, fop = feat_pad[l], feat_pad[l + 1]
        ls = scale if l == num_layers - 1 else 1.0
        Wl = jnp.stack([params[b][l][0].T * ls for b in range(num_bands)], axis=0)
        Wl = jnp.pad(Wl, ((0, 0), (0, fip - fi), (0, fop - fo)))
        bl = jnp.stack([params[b][l][1] * ls for b in range(num_bands)], axis=0)
        bl = jnp.pad(bl, ((0, 0), (0, fop - fo))).reshape(num_bands, 1, fop)
        w_inputs.append(Wl.astype(compute_dtype))
        w_inputs.append(bl.astype(jnp.float32))

    weight_bytes = sum(int(w.size) * w.dtype.itemsize for w in w_inputs)

    # ---- tile sizing: big row tiles, auto-shrunk to a v7x-safe VMEM budget ----
    tile_rows = max(8, min(int(tile_rows), _round_up(rows, 8)))
    tile_rows = _round_up(tile_rows, 8)

    def _vmem_est(tr):
        return (2 * tr * num_bands * in_features * 4          # x tile, double-buffered
                + 2 * tr * num_bands * fout_p * 4             # out tile, double-buffered
                + 2 * weight_bytes                            # weights (double-buffered)
                + tr * num_offsets * f1p * 8                  # layer-0 activations + staging
                + 4 * tr * max(feat_pad[1:]) * 4)             # per-offset temporaries slack

    while _vmem_est(tile_rows) > 40 * 1024 * 1024 and tile_rows > 256:
        tile_rows = max(256, tile_rows // 2)

    grid = (pl.cdiv(rows, tile_rows),)   # partial edge block handled by Pallas masking
    # TODO(synk): for tiny inputs on v7x (single row tile) add num_bands as a
    # second parallel grid axis so both TensorCores get work.

    in_specs = [pl.BlockSpec((tile_rows, num_bands * in_features), lambda i: (i, 0))]
    in_specs.append(pl.BlockSpec((num_bands, in_features, num_offsets * f1p),
                                 lambda i: (0, 0, 0)))
    in_specs.append(pl.BlockSpec((num_bands, 1, num_offsets * f1p),
                                 lambda i: (0, 0, 0)))
    for l in range(1, num_layers):
        fip, fop = feat_pad[l], feat_pad[l + 1]
        in_specs.append(pl.BlockSpec((num_bands, fip, fop), lambda i: (0, 0, 0)))
        in_specs.append(pl.BlockSpec((num_bands, 1, fop), lambda i: (0, 0, 0)))
    out_spec = pl.BlockSpec((tile_rows, num_bands * fout_p), lambda i: (i, 0))

    # Advisory cost estimate for XLA scheduling around the custom call.
    flops = 2 * rows * num_bands * (
        in_features * num_offsets * f1p
        + num_offsets * sum(feat_pad[l] * feat_pad[l + 1] for l in range(1, num_layers)))
    bytes_accessed = (int(x2.size) * x2.dtype.itemsize
                      + weight_bytes
                      + rows * num_bands * fout_p * 4)
    cost = pl.CostEstimate(flops=flops, transcendentals=0,
                           bytes_accessed=bytes_accessed)

    est = _vmem_est(tile_rows)
    vmem_limit = None
    if est > 10 * 1024 * 1024:
        vmem_limit = min(max(2 * est, 32 * 1024 * 1024), 48 * 1024 * 1024)

    kernel = _make_kernel(num_bands, num_offsets, num_layers, pooling,
                          compute_dtype, in_features, f1p, fout_p)

    out = pl.pallas_call(
        kernel,
        out_shape=jax.ShapeDtypeStruct((rows, num_bands * fout_p), jnp.float32),
        grid_spec=pltpu.PrefetchScalarGridSpec(
            num_scalar_prefetch=0,
            grid=grid,
            in_specs=in_specs,
            out_specs=out_spec,
        ),
        compiler_params=pltpu.CompilerParams(
            dimension_semantics=("parallel",),
            vmem_limit_bytes=vmem_limit,
        ),
        cost_estimate=cost,
    )(x2, *w_inputs)

    # Free reshape + lane slice: (rows, B*Fout_p) -> (T, N, B, Fout).
    out = out.reshape(rows, num_bands, fout_p)[:, :, :fout]
    return out.reshape(T, N, num_bands, fout)


def _init_params(key, num_bands, in_features, mlp_features):
    """PyTorch nn.Linear default init: U(-1/sqrt(fan_in), 1/sqrt(fan_in))."""
    params = []
    for _ in range(num_bands):
        band_params = []
        fi = in_features
        for fo in mlp_features:
            key, kw, kb = jax.random.split(key, 3)
            bound = 1.0 / math.sqrt(fi)
            W = jax.random.uniform(kw, (fo, fi), jnp.float32, -bound, bound)
            b = jax.random.uniform(kb, (fo,), jnp.float32, -bound, bound)
            band_params.append((W, b))
            fi = fo
        params.append(band_params)
    return params


def _reference(x, params, *, offsets=(-1, 0, 1), pooling="mean", use_bf16=True):
    """Pure-JAX reference of the PyTorch forward (same bf16 operand casts)."""
    offsets = tuple(offsets) if len(offsets) > 0 else (0,)
    T, N, num_bands = x.shape[0], x.shape[1], x.shape[2]
    in_features = 1
    for d in x.shape[3:]:
        in_features *= int(d)
    cdt = jnp.bfloat16 if use_bf16 else jnp.float32
    outs = []
    for b in range(num_bands):
        xb = x[:, :, b]                                        # (T, N, C, ...)
        xb = jnp.stack([jnp.roll(xb, off, axis=2) for off in offsets], axis=2)
        h = xb.reshape(T, N, len(offsets), in_features)
        for (W, bias) in params[b]:
            h = jnp.dot(h.astype(cdt), W.T.astype(cdt),
                        preferred_element_type=jnp.float32) + bias
            h = jnp.maximum(h, 0.0)
        outs.append(h.max(axis=2) if pooling == "max" else h.mean(axis=2))
    return jnp.stack(outs, axis=2)


if __name__ == "__main__":
    # Input (T, N, num_bands, electrode_channels, freq): in_features = C*freq.
    T, N, num_bands, C, freq = 8, 2, 2, 16, 2          # in_features = 32
    mlp_features = (64, 128)
    key = jax.random.PRNGKey(0)
    kx, kp = jax.random.split(key)
    x = jax.random.normal(kx, (T, N, num_bands, C, freq), dtype=jnp.float32)
    params = _init_params(kp, num_bands, C * freq, mlp_features)

    for pooling in ("mean", "max"):
        out = multiband_rotation_invariant_mlp(x, params, pooling=pooling)
        out = jax.block_until_ready(out)
        ref = _reference(x, params, pooling=pooling)
        assert out.shape == (T, N, num_bands, mlp_features[-1])
        assert jnp.allclose(out, ref, atol=2e-2, rtol=2e-2), (
            pooling, float(jnp.max(jnp.abs(out - ref))))
    print("KERNEL_OK")
</pallas_src>

<mosaic_0001>
module attributes {stable_mosaic.version = 11 : i64} {
  func.func @kernel(%arg0: i32, %arg1: memref<16x64xf32, #tpu.memory_space<vmem>>, %arg2: memref<2x32x384xbf16, #tpu.memory_space<vmem>>, %arg3: memref<2x1x384xf32, #tpu.memory_space<vmem>>, %arg4: memref<2x128x128xbf16, #tpu.memory_space<vmem>>, %arg5: memref<2x1x128xf32, #tpu.memory_space<vmem>>, %arg6: memref<16x256xf32, #tpu.memory_space<vmem>>) attributes {dimension_semantics = [#tpu.dimension_semantics<parallel>], iteration_bounds = array<i64: 1>, scalar_prefetch = 0 : i64, scratch_operands = 0 : i64, tpu.core_type = #tpu.core_type<tc>, window_params = [{transform_indices = @transform_0, window_bounds = array<i64: 16, 64>}, {pipeline_mode = #tpu.pipeline_mode<synchronous>, transform_indices = @transform_1, window_bounds = array<i64: 2, 32, 384>}, {pipeline_mode = #tpu.pipeline_mode<synchronous>, transform_indices = @transform_2, window_bounds = array<i64: 2, 1, 384>}, {pipeline_mode = #tpu.pipeline_mode<synchronous>, transform_indices = @transform_3, window_bounds = array<i64: 2, 128, 128>}, {pipeline_mode = #tpu.pipeline_mode<synchronous>, transform_indices = @transform_4, window_bounds = array<i64: 2, 1, 128>}, {transform_indices = @transform_5, window_bounds = array<i64: 16, 256>}]} {
    %c0 = arith.constant 0 : index
    %c0_0 = arith.constant 0 : index
    %0 = vector.load %arg1[%c0, %c0_0] : memref<16x64xf32, #tpu.memory_space<vmem>>, vector<16x64xf32>
    %1 = vector.extract_strided_slice %0 {offsets = [0, 0], sizes = [16, 32], strides = [1, 1]} : vector<16x64xf32> to vector<16x32xf32>
    %2 = arith.truncf %1 : vector<16x32xf32> to vector<16x32xbf16>
    %c0_1 = arith.constant 0 : index
    %c0_2 = arith.constant 0 : index
    %c0_3 = arith.constant 0 : index
    %3 = vector.load %arg2[%c0_1, %c0_2, %c0_3] : memref<2x32x384xbf16, #tpu.memory_space<vmem>>, vector<1x32x384xbf16>
    %4 = vector.shape_cast %3 : vector<1x32x384xbf16> to vector<32x384xbf16>
    %c0_4 = arith.constant 0 : index
    %c0_5 = arith.constant 0 : index
    %c0_6 = arith.constant 0 : index
    %5 = vector.load %arg3[%c0_4, %c0_5, %c0_6] : memref<2x1x384xf32, #tpu.memory_space<vmem>>, vector<1x1x384xf32>
    %6 = vector.shape_cast %5 : vector<1x1x384xf32> to vector<1x384xf32>
    %cst = arith.constant dense<0.000000e+00> : vector<16x384xf32>
    %7 = tpu.matmul %2, %4, %cst {dimension_numbers = #tpu.dot_dimension_numbers<[1], [0], [0], [1], [0, 0, 1, 1], [], []>} : vector<16x32xbf16>, vector<32x384xbf16>, vector<16x384xf32> -> vector<16x384xf32>
    %8 = vector.broadcast %6 : vector<1x384xf32> to vector<16x384xf32>
    %9 = arith.addf %7, %8 : vector<16x384xf32>
    %cst_7 = arith.constant 0.000000e+00 : f32
    %10 = vector.broadcast %cst_7 : f32 to vector<16x384xf32>
    %11 = arith.maximumf %9, %10 : vector<16x384xf32>
    %12 = vector.extract_strided_slice %11 {offsets = [0, 0], sizes = [16, 128], strides = [1, 1]} : vector<16x384xf32> to vector<16x128xf32>
    %c0_8 = arith.constant 0 : index
    %c0_9 = arith.constant 0 : index
    %c0_10 = arith.constant 0 : index
    %13 = vector.load %arg4[%c0_8, %c0_9, %c0_10] : memref<2x128x128xbf16, #tpu.memory_space<vmem>>, vector<1x128x128xbf16>
    %14 = vector.shape_cast %13 : vector<1x128x128xbf16> to vector<128x128xbf16>
    %c0_11 = arith.constant 0 : index
    %c0_12 = arith.constant 0 : index
    %c0_13 = arith.constant 0 : index
    %15 = vector.load %arg5[%c0_11, %c0_12, %c0_13] : memref<2x1x128xf32, #tpu.memory_space<vmem>>, vector<1x1x128xf32>
    %16 = vector.shape_cast %15 : vector<1x1x128xf32> to vector<1x128xf32>
    %17 = arith.truncf %12 : vector<16x128xf32> to vector<16x128xbf16>
    %cst_14 = arith.constant dense<0.000000e+00> : vector<16x128xf32>
    %18 = tpu.matmul %17, %14, %cst_14 {dimension_numbers = #tpu.dot_dimension_numbers<[1], [0], [0], [1], [0, 0, 1, 1], [], []>} : vector<16x128xbf16>, vector<128x128xbf16>, vector<16x128xf32> -> vector<16x128xf32>
    %19 = vector.broadcast %16 : vector<1x128xf32> to vector<16x128xf32>
    %20 = arith.addf %18, %19 : vector<16x128xf32>
    %cst_15 = arith.constant 0.000000e+00 : f32
    %21 = vector.broadcast %cst_15 : f32 to vector<16x128xf32>
    %22 = arith.maximumf %20, %21 : vector<16x128xf32>
    %23 = vector.extract_strided_slice %11 {offsets = [0, 128], sizes = [16, 128], strides = [1, 1]} : vector<16x384xf32> to vector<16x128xf32>
    %c0_16 = arith.constant 0 : index
    %c0_17 = arith.constant 0 : index
    %c0_18 = arith.constant 0 : index
    %24 = vector.load %arg4[%c0_16, %c0_17, %c0_18] : memref<2x128x128xbf16, #tpu.memory_space<vmem>>, vector<1x128x128xbf16>
    %25 = vector.shape_cast %24 : vector<1x128x128xbf16> to vector<128x128xbf16>
    %c0_19 = arith.constant 0 : index
    %c0_20 = arith.constant 0 : index
    %c0_21 = arith.constant 0 : index
    %26 = vector.load %arg5[%c0_19, %c0_20, %c0_21] : memref<2x1x128xf32, #tpu.memory_space<vmem>>, vector<1x1x128xf32>
    %27 = vector.shape_cast %26 : vector<1x1x128xf32> to vector<1x128xf32>
    %28 = arith.truncf %23 : vector<16x128xf32> to vector<16x128xbf16>
    %cst_22 = arith.constant dense<0.000000e+00> : vector<16x128xf32>
    %29 = tpu.matmul %28, %25, %cst_22 {dimension_numbers = #tpu.dot_dimension_numbers<[1], [0], [0], [1], [0, 0, 1, 1], [], []>} : vector<16x128xbf16>, vector<128x128xbf16>, vector<16x128xf32> -> vector<16x128xf32>
    %30 = vector.broadcast %27 : vector<1x128xf32> to vector<16x128xf32>
    %31 = arith.addf %29, %30 : vector<16x128xf32>
    %cst_23 = arith.constant 0.000000e+00 : f32
    %32 = vector.broadcast %cst_23 : f32 to vector<16x128xf32>
    %33 = arith.maximumf %31, %32 : vector<16x128xf32>
    %34 = arith.addf %22, %33 : vector<16x128xf32>
    %35 = vector.extract_strided_slice %11 {offsets = [0, 256], sizes = [16, 128], strides = [1, 1]} : vector<16x384xf32> to vector<16x128xf32>
    %c0_24 = arith.constant 0 : index
    %c0_25 = arith.constant 0 : index
    %c0_26 = arith.constant 0 : index
    %36 = vector.load %arg4[%c0_24, %c0_25, %c0_26] : memref<2x128x128xbf16, #tpu.memory_space<vmem>>, vector<1x128x128xbf16>
    %37 = vector.shape_cast %36 : vector<1x128x128xbf16> to vector<128x128xbf16>
    %c0_27 = arith.constant 0 : index
    %c0_28 = arith.constant 0 : index
    %c0_29 = arith.constant 0 : index
    %38 = vector.load %arg5[%c0_27, %c0_28, %c0_29] : memref<2x1x128xf32, #tpu.memory_space<vmem>>, vector<1x1x128xf32>
    %39 = vector.shape_cast %38 : vector<1x1x128xf32> to vector<1x128xf32>
    %40 = arith.truncf %35 : vector<16x128xf32> to vector<16x128xbf16>
    %cst_30 = arith.constant dense<0.000000e+00> : vector<16x128xf32>
    %41 = tpu.matmul %40, %37, %cst_30 {dimension_numbers = #tpu.dot_dimension_numbers<[1], [0], [0], [1], [0, 0, 1, 1], [], []>} : vector<16x128xbf16>, vector<128x128xbf16>, vector<16x128xf32> -> vector<16x128xf32>
    %42 = vector.broadcast %39 : vector<1x128xf32> to vector<16x128xf32>
    %43 = arith.addf %41, %42 : vector<16x128xf32>
    %cst_31 = arith.constant 0.000000e+00 : f32
    %44 = vector.broadcast %cst_31 : f32 to vector<16x128xf32>
    %45 = arith.maximumf %43, %44 : vector<16x128xf32>
    %46 = arith.addf %34, %45 : vector<16x128xf32>
    %c0_32 = arith.constant 0 : index
    %c0_33 = arith.constant 0 : index
    %47 = vector.load %arg6[%c0_32, %c0_33] : memref<16x256xf32, #tpu.memory_space<vmem>>, vector<16x128xf32>
    tpu.vector_store %arg6[%c0_32, %c0_33], %46 {strides = array<i32>} : memref<16x256xf32, #tpu.memory_space<vmem>>, vector<16x128xf32>,
    %48 = vector.extract_strided_slice %0 {offsets = [0, 32], sizes = [16, 32], strides = [1, 1]} : vector<16x64xf32> to vector<16x32xf32>
    %49 = arith.truncf %48 : vector<16x32xf32> to vector<16x32xbf16>
    %c1 = arith.constant 1 : index
    %c0_34 = arith.constant 0 : index
    %c0_35 = arith.constant 0 : index
    %50 = vector.load %arg2[%c1, %c0_34, %c0_35] : memref<2x32x384xbf16, #tpu.memory_space<vmem>>, vector<1x32x384xbf16>
    %51 = vector.shape_cast %50 : vector<1x32x384xbf16> to vector<32x384xbf16>
    %c1_36 = arith.constant 1 : index
    %c0_37 = arith.constant 0 : index
    %c0_38 = arith.constant 0 : index
    %52 = vector.load %arg3[%c1_36, %c0_37, %c0_38] : memref<2x1x384xf32, #tpu.memory_space<vmem>>, vector<1x1x384xf32>
    %53 = vector.shape_cast %52 : vector<1x1x384xf32> to vector<1x384xf32>
    %cst_39 = arith.constant dense<0.000000e+00> : vector<16x384xf32>
    %54 = tpu.matmul %49, %51, %cst_39 {dimension_numbers = #tpu.dot_dimension_numbers<[1], [0], [0], [1], [0, 0, 1, 1], [], []>} : vector<16x32xbf16>, vector<32x384xbf16>, vector<16x384xf32> -> vector<16x384xf32>
    %55 = vector.broadcast %53 : vector<1x384xf32> to vector<16x384xf32>
    %56 = arith.addf %54, %55 : vector<16x384xf32>
    %cst_40 = arith.constant 0.000000e+00 : f32
    %57 = vector.broadcast %cst_40 : f32 to vector<16x384xf32>
    %58 = arith.maximumf %56, %57 : vector<16x384xf32>
    %59 = vector.extract_strided_slice %58 {offsets = [0, 0], sizes = [16, 128], strides = [1, 1]} : vector<16x384xf32> to vector<16x128xf32>
    %c1_41 = arith.constant 1 : index
    %c0_42 = arith.constant 0 : index
    %c0_43 = arith.constant 0 : index
    %60 = vector.load %arg4[%c1_41, %c0_42, %c0_43] : memref<2x128x128xbf16, #tpu.memory_space<vmem>>, vector<1x128x128xbf16>
    %61 = vector.shape_cast %60 : vector<1x128x128xbf16> to vector<128x128xbf16>
    %c1_44 = arith.constant 1 : index
    %c0_45 = arith.constant 0 : index
    %c0_46 = arith.constant 0 : index
    %62 = vector.load %arg5[%c1_44, %c0_45, %c0_46] : memref<2x1x128xf32, #tpu.memory_space<vmem>>, vector<1x1x128xf32>
    %63 = vector.shape_cast %62 : vector<1x1x128xf32> to vector<1x128xf32>
    %64 = arith.truncf %59 : vector<16x128xf32> to vector<16x128xbf16>
    %cst_47 = arith.constant dense<0.000000e+00> : vector<16x128xf32>
    %65 = tpu.matmul %64, %61, %cst_47 {dimension_numbers = #tpu.dot_dimension_numbers<[1], [0], [0], [1], [0, 0, 1, 1], [], []>} : vector<16x128xbf16>, vector<128x128xbf16>, vector<16x128xf32> -> vector<16x128xf32>
    %66 = vector.broadcast %63 : vector<1x128xf32> to vector<16x128xf32>
    %67 = arith.addf %65, %66 : vector<16x128xf32>
    %cst_48 = arith.constant 0.000000e+00 : f32
    %68 = vector.broadcast %cst_48 : f32 to vector<16x128xf32>
    %69 = arith.maximumf %67, %68 : vector<16x128xf32>
    %70 = vector.extract_strided_slice %58 {offsets = [0, 128], sizes = [16, 128], strides = [1, 1]} : vector<16x384xf32> to vector<16x128xf32>
    %c1_49 = arith.constant 1 : index
    %c0_50 = arith.constant 0 : index
    %c0_51 = arith.constant 0 : index
    %71 = vector.load %arg4[%c1_49, %c0_50, %c0_51] : memref<2x128x128xbf16, #tpu.memory_space<vmem>>, vector<1x128x128xbf16>
    %72 = vector.shape_cast %71 : vector<1x128x128xbf16> to vector<128x128xbf16>
    %c1_52 = arith.constant 1 : index
    %c0_53 = arith.constant 0 : index
    %c0_54 = arith.constant 0 : index
    %73 = vector.load %arg5[%c1_52, %c0_53, %c0_54] : memref<2x1x128xf32, #tpu.memory_space<vmem>>, vector<1x1x128xf32>
    %74 = vector.shape_cast %73 : vector<1x1x128xf32> to vector<1x128xf32>
    %75 = arith.truncf %70 : vector<16x128xf32> to vector<16x128xbf16>
    %cst_55 = arith.constant dense<0.000000e+00> : vector<16x128xf32>
    %76 = tpu.matmul %75, %72, %cst_55 {dimension_numbers = #tpu.dot_dimension_numbers<[1], [0], [0], [1], [0, 0, 1, 1], [], []>} : vector<16x128xbf16>, vector<128x128xbf16>, vector<16x128xf32> -> vector<16x128xf32>
    %77 = vector.broadcast %74 : vector<1x128xf32> to vector<16x128xf32>
    %78 = arith.addf %76, %77 : vector<16x128xf32>
    %cst_56 = arith.constant 0.000000e+00 : f32
    %79 = vector.broadcast %cst_56 : f32 to vector<16x128xf32>
    %80 = arith.maximumf %78, %79 : vector<16x128xf32>
    %81 = arith.addf %69, %80 : vector<16x128xf32>
    %82 = vector.extract_strided_slice %58 {offsets = [0, 256], sizes = [16, 128], strides = [1, 1]} : vector<16x384xf32> to vector<16x128xf32>
    %c1_57 = arith.constant 1 : index
    %c0_58 = arith.constant 0 : index
    %c0_59 = arith.constant 0 : index
    %83 = vector.load %arg4[%c1_57, %c0_58, %c0_59] : memref<2x128x128xbf16, #tpu.memory_space<vmem>>, vector<1x128x128xbf16>
    %84 = vector.shape_cast %83 : vector<1x128x128xbf16> to vector<128x128xbf16>
    %c1_60 = arith.constant 1 : index
    %c0_61 = arith.constant 0 : index
    %c0_62 = arith.constant 0 : index
    %85 = vector.load %arg5[%c1_60, %c0_61, %c0_62] : memref<2x1x128xf32, #tpu.memory_space<vmem>>, vector<1x1x128xf32>
    %86 = vector.shape_cast %85 : vector<1x1x128xf32> to vector<1x128xf32>
    %87 = arith.truncf %82 : vector<16x128xf32> to vector<16x128xbf16>
    %cst_63 = arith.constant dense<0.000000e+00> : vector<16x128xf32>
    %88 = tpu.matmul %87, %84, %cst_63 {dimension_numbers = #tpu.dot_dimension_numbers<[1], [0], [0], [1], [0, 0, 1, 1], [], []>} : vector<16x128xbf16>, vector<128x128xbf16>, vector<16x128xf32> -> vector<16x128xf32>
    %89 = vector.broadcast %86 : vector<1x128xf32> to vector<16x128xf32>
    %90 = arith.addf %88, %89 : vector<16x128xf32>
    %cst_64 = arith.constant 0.000000e+00 : f32
    %91 = vector.broadcast %cst_64 : f32 to vector<16x128xf32>
    %92 = arith.maximumf %90, %91 : vector<16x128xf32>
    %93 = arith.addf %81, %92 : vector<16x128xf32>
    %c0_65 = arith.constant 0 : index
    %c128 = arith.constant 128 : index
    %94 = vector.load %arg6[%c0_65, %c128] : memref<16x256xf32, #tpu.memory_space<vmem>>, vector<16x128xf32>
    tpu.vector_store %arg6[%c0_65, %c128], %93 {strides = array<i32>} : memref<16x256xf32, #tpu.memory_space<vmem>>, vector<16x128xf32>,
    return
  }
  func.func @transform_0(%arg0: i32) -> (i32, i32) {
    %c0_i32 = arith.constant 0 : i32
    %c0_i32_0 = arith.constant 0 : i32
    return %arg0, %c0_i32 : i32, i32
  }
  func.func @transform_1(%arg0: i32) -> (i32, i32, i32) {
    %c0_i32 = arith.constant 0 : i32
    %c0_i32_0 = arith.constant 0 : i32
    %c0_i32_1 = arith.constant 0 : i32
    %c0_i32_2 = arith.constant 0 : i32
    return %c0_i32, %c0_i32_0, %c0_i32_1 : i32, i32, i32
  }
  func.func @transform_2(%arg0: i32) -> (i32, i32, i32) {
    %c0_i32 = arith.constant 0 : i32
    %c0_i32_0 = arith.constant 0 : i32
    %c0_i32_1 = arith.constant 0 : i32
    %c0_i32_2 = arith.constant 0 : i32
    return %c0_i32, %c0_i32_0, %c0_i32_1 : i32, i32, i32
  }
  func.func @transform_3(%arg0: i32) -> (i32, i32, i32) {
    %c0_i32 = arith.constant 0 : i32
    %c0_i32_0 = arith.constant 0 : i32
    %c0_i32_1 = arith.constant 0 : i32
    %c0_i32_2 = arith.constant 0 : i32
    return %c0_i32, %c0_i32_0, %c0_i32_1 : i32, i32, i32
  }
  func.func @transform_4(%arg0: i32) -> (i32, i32, i32) {
    %c0_i32 = arith.constant 0 : i32
    %c0_i32_0 = arith.constant 0 : i32
    %c0_i32_1 = arith.constant 0 : i32
    %c0_i32_2 = arith.constant 0 : i32
    return %c0_i32, %c0_i32_0, %c0_i32_1 : i32, i32, i32
  }
  func.func @transform_5(%arg0: i32) -> (i32, i32) {
    %c0_i32 = arith.constant 0 : i32
    %c0_i32_0 = arith.constant 0 : i32
    return %arg0, %c0_i32 : i32, i32
  }
}

</mosaic_0001>

<bundles_post_ra>
// kernel: tpu_custom_call.1
= control target key start
LH: loop header
LB: loop body
LE: loop exit
PB: predicated region body
PF: predicated region fallthrough
CT: control target
= control target key end

     0   :  { %10 = vsyncpa [#allocation3], 0  ;;  %s1461_s0 = inlined_call_operand.hbm [shape: f32[16,64], index: 0, kind: input, shape index: {}]   ;;  %s1462_s1 = inlined_call_operand.hbm [shape: bf16[2,32,384], index: 1, kind: input, shape index: {}]   ;;  %s1463_s2 = inlined_call_operand.vmem [shape: f32[2,1,384], index: 2, kind: input, shape index: {}]   ;;  %s1464_s3 = inlined_call_operand.hbm [shape: bf16[2,128,128], index: 3, kind: input, shape index: {}]   ;;  %s1465_s4 = inlined_call_operand.vmem [shape: f32[2,1,128], index: 4, kind: input, shape index: {}]   ;;  %s1466_s5 = inlined_call_operand.hbm [shape: f32[16,256], index: 5, kind: output, shape index: {}]  }
   0x1   :  { %11 = vsyncpa [#allocation6], 0 }
   0x2   :  { %12 = vsyncpa [#allocation4], 0  ;;  %s1184_s18 = smov [#allocation5]   ;;  %s1090_s22 = scalar_lea.hbm %s1462_s1, 1536 }
   0x3   :  { %s30_s19 = sshll.u32 %s1184_s18, 4  ;;  %p1091_p0 = scmp.ne.s32.totalorder %s1462_s1, %s1090_s22  ;;  %s31_s19 = int_to_ptr.vmem [resolvable:$true] %s30_s19 }
   0x4   :  { %p1094_p1 = scmp.lt.u32.totalorder %s1090_s22, %s1462_s1 }
   0x6   :  { %p1096_p2 = pnand %p1094_p1, %p1091_p0 }
   0x8   :  { %1099 = shalt.err (!%p1096_p2)
}
   0x9   :  { %s1100_s27 = scalar_lea.vmem %s31_s19, 1536  ;;  %p1105_p4 = scmp.lt.s32.totalorder %s31_s19, %s31_s19 }
   0xa   :  { %p1101_p3 = scmp.ne.s32.totalorder %s31_s19, %s1100_s27  ;;  %p1106_p5 = scmp.lt.s32.totalorder %s1100_s27, %s1100_s27 }
   0xc   :  { %p1107_p6 = por %p1106_p5, %p1105_p4 }
   0xe   :  { %p1108_p7 = pnand %p1107_p6, %p1101_p3 }
  0x10   :  { %1111 = shalt.err (!%p1108_p7)
}
  0x11   :  { %s1185_s28 = smov 192   ;;  %s1186_s29 = smov 12  }
  0x12   :  { %36 = dma.hbm_to_vmem [thread:$0]  %s1462_s1, 1536, %s31_s19, [#allocation6], %s1185_s28, %s1185_s28, %s1186_s29  }
  0x13   :  { %s1187_s7 = smov [#allocation2]   ;;  %s1112_s11 = scalar_lea.hbm %s1461_s0, 256 }
  0x14   :  { %s18_s8 = sshll.u32 %s1187_s7, 4  ;;  %p1113_p8 = scmp.ne.s32.totalorder %s1461_s0, %s1112_s11  ;;  %s19_s8 = int_to_ptr.vmem [resolvable:$true] %s18_s8 }
  0x15   :  { %p1116_p9 = scmp.lt.u32.totalorder %s1112_s11, %s1461_s0 }
  0x17   :  { %p1118_p10 = pnand %p1116_p9, %p1113_p8 }
  0x19   :  { %1121 = shalt.err (!%p1118_p10)
}
  0x1a   :  { %s1122_s16 = scalar_lea.vmem %s19_s8, 256  ;;  %p1127_p12 = scmp.lt.s32.totalorder %s19_s8, %s19_s8 }
  0x1b   :  { %p1123_p11 = scmp.ne.s32.totalorder %s19_s8, %s1122_s16  ;;  %p1128_p13 = scmp.lt.s32.totalorder %s1122_s16, %s1122_s16 }
  0x1d   :  { %p1129_p0 = por %p1128_p13, %p1127_p12 }
  0x1f   :  { %p1130_p1 = pnand %p1129_p0, %p1123_p11 }
  0x21   :  { %1133 = shalt.err (!%p1130_p1)
}
  0x22   :  { %s1188_s1 = smov 128   ;;  %s1189_s17 = smov 8  }
  0x23   :  { %24 = dma.hbm_to_vmem [thread:$0]  %s1461_s0, 256, %s19_s8, [#allocation3], %s1188_s1, %s1188_s1, %s1189_s17  }
  0x24   :  { %s1190_s20 = smov [#allocation7]   ;;  %s1134_s24 = scalar_lea.hbm %s1464_s3, 2048 }
  0x25   :  { %s44_s21 = sshll.u32 %s1190_s20, 4  ;;  %p1135_p2 = scmp.ne.s32.totalorder %s1464_s3, %s1134_s24  ;;  %s45_s21 = int_to_ptr.vmem [resolvable:$true] %s44_s21 }
  0x26   :  { %p1138_p3 = scmp.lt.u32.totalorder %s1134_s24, %s1464_s3 }
  0x28   :  { %p1140_p4 = pnand %p1138_p3, %p1135_p2 }
  0x2a   :  { %1143 = shalt.err (!%p1140_p4)
}
  0x2b   :  { %s1144_s29 = scalar_lea.vmem %s45_s21, 2048  ;;  %p1149_p6 = scmp.lt.s32.totalorder %s45_s21, %s45_s21 }
  0x2c   :  { %p1145_p5 = scmp.ne.s32.totalorder %s45_s21, %s1144_s29  ;;  %p1150_p7 = scmp.lt.s32.totalorder %s1144_s29, %s1144_s29 }
  0x2e   :  { %p1151_p8 = por %p1150_p7, %p1149_p6 }
  0x30   :  { %p1152_p9 = pnand %p1151_p8, %p1145_p5 }
  0x32   :  { %1155 = shalt.err (!%p1152_p9)
}
  0x33   :  { %s1191_s0 = smov 64   ;;  %s1192_s30 = smov 4  }
  0x34   :  { %50 = dma.hbm_to_vmem [thread:$0]  %s1464_s3, 2048, %s45_s21, [#allocation6], %s1191_s0, %s1191_s0, %s1192_s30  }
  0x35   :  { %1178 = dma.done.wait [#allocation3], 256  }
  0x36   :  { %1179 = vsyncadd [#allocation3], 4294967040 }
  0x37   :  { %1180 = dma.done.wait [#allocation6], 3584  }
  0x38   :  { %1181 = vsyncadd [#allocation6], 4294963712  ;;  %v1193_v0 = vmov 0   ;;  %v1194_v1 = vmov 0.0   ;;  %vm1195_vm0 = vmmov 0   ;;  %v63_v6 = vld [vmem:[#allocation2] sm:$0xff]  ;;  %v76_v20 = vlaneseq }
  0x39   :  { %159 = vmatprep.mubr.bf16.mxu0 %v1193_v0  ;;  %934 = vmatprep.subr.bf16.mxu1 %v1194_v1  ;;  %v1058_v2 = vld [vmem:[#allocation5 + $0x4] ss:$12 sps:$4 sm:$0xff]   ;;  %v1060_v3 = vld [vmem:[#allocation5] ss:$12 sps:$4 sm:$0xff]   ;;  %v1061_v4 = vld [vmem:[#allocation5 + $0x1c] ss:$12 sps:$4 sm:$0xff]  }
  0x3a   :  { %950 = vmatprep.mubr.msk.bf16.mxu1 %vm1195_vm0, %v1194_v1  ;;  %127 = vmatprep.subr.bf16.mxu0 %v1058_v2  ;;  %v1063_v5 = vld [vmem:[#allocation5 + $0x18] ss:$12 sps:$4 sm:$0xff]   ;;  %vm123_vm1 = vcmask 261120   ;;  %s1196_s3 = smov 96   ;;  %v1064_v10 = vld [vmem:[#allocation5 + $0x8] ss:$12 sps:$4 sm:$0xff]  }
  0x3b   :  { %128 = vmatpush1.bf16.msra.mxu0 %v1060_v3  ;;  %v64_v7 = vld [vmem:[#allocation2 + $0x8] sm:$0xff]  ;;  %v1270_v9 = vld [vmem:[#allocation7] sm:$0xff]   ;;  %v1276_v11 = vld [vmem:[#allocation7 + $0x8] sm:$0xff]   ;;  %v1326_v21 = vshrl.u32 %v76_v20, 7 }
  0x3c   :  { %129 = vmatprep.subr.bf16.mxu0 %v1061_v4  ;;  %v65_v8 = vpack.c.bf16 %v64_v7, %v63_v6  ;;  %935 = vmatpush3.bf16.msra.mxu1 %v1270_v9  ;;  %v1065_v12 = vld [vmem:[#allocation5 + $0x20] ss:$12 sps:$4 sm:$0xff]   ;;  %v1282_v13 = vld [vmem:[#allocation7 + $0x10] sm:$0xff]   ;;  %v1287_v14 = vld [vmem:[#allocation7 + $0x18] sm:$0xff]  }
  0x3d   :  { %936 = vmatprep.subr.bf16.mxu1 %v1194_v1  ;;  %v1297_v15 = vld [vmem:[#allocation7 + $0x20] sm:$0xff]   ;;  %v1303_v16 = vld [vmem:[#allocation7 + $0x28] sm:$0xff]   ;;  %v1315_v17 = vld [vmem:[#allocation7 + $0x30] sm:$0xff]   ;;  %v78_v22 = vsub.s32 0, %v1326_v21  ;;  %v82_v24 = vsub.s32 1, %v1326_v21  ;;  %v86_v30 = vsub.s32 2, %v1326_v21 }
  0x3e   :  { %454 = vrot.lane.b32.xlu0 %v65_v8, %s1196_s3  ;;  %v1321_v18 = vld [vmem:[#allocation7 + $0x38] sm:$0xff]   ;;  %v1076_v19 = vld [vmem:[#allocation5 + $0x34] ss:$12 sps:$4 sm:$0xff]   ;;  %v74_v23 = vld [vmem:[%s1463_s2] sm:$0x7] }
  0x3f   :  { %130 = vmatpush1.bf16.msra.mxu0 %v1063_v5  ;;  %v79_v25 = vrot.slane %v74_v23, %v78_v22  ;;  %v83_v26 = vrot.slane %v74_v23, %v82_v24  ;;  %v87_v38 = vrot.slane %v74_v23, %v86_v30  ;;  %v1074_v42 = vld [vmem:[#allocation5 + $0x30] ss:$12 sps:$4 sm:$0xff]   ;;  %v1079_v44 = vld [vmem:[#allocation5 + $0x4c] ss:$12 sps:$4 sm:$0xff]   ;;  %v1077_v49 = vld [vmem:[#allocation5 + $0x48] ss:$12 sps:$4 sm:$0xff]  }
  0x40   :  { %906 = vmatprep.subr.bf16.mxu0 %v1194_v1  ;;  %937 = vmatpush3.bf16.msra.mxu1 %v1276_v11  ;;  %v1080_v55 = vld [vmem:[#allocation5 + $0x38] ss:$12 sps:$4 sm:$0xff]   ;;  %v1081_v57 = vld [vmem:[#allocation5 + $0x50] ss:$12 sps:$4 sm:$0xff]   ;;  %v1363_v59 = vld [vmem:[#allocation7 + $0x48] sm:$0xff]  }
  0x41   :  { %938 = vmatprep.subr.bf16.mxu1 %v1194_v1  ;;  %v1356_v58 = vld [vmem:[#allocation7 + $0x40] sm:$0xff]   ;;  %v1371_v60 = vld [vmem:[#allocation7 + $0x50] sm:$0xff]   ;;  %v1377_v61 = vld [vmem:[#allocation7 + $0x58] sm:$0xff]  }
  0x42   :  { %816 = vmatmul.mubr.msk.bf16.vlgmr.msra.gmra.mrb[0].mxu0 %vm123_vm1, %v65_v8  ;;  %v1394_v62 = vld [vmem:[#allocation7 + $0x60] sm:$0xff]   ;;  %v1400_v63 = vld [vmem:[#allocation7 + $0x68] sm:$0xff]   ;;  %v1412_v2 = vld [vmem:[#allocation7 + $0x78] sm:$0xff]  }
  0x43   :  { %907 = vmatpush3.bf16.msra.mxu0 %v1064_v10  ;;  %910 = vmatprep.mubr.msk.bf16.mxu0 %vm1195_vm0, %v1194_v1  ;;  %v818_v3 = vld [vmem:[%s1465_s4] ss:$0 sm:$0xff] }
  0x44   :  { %908 = vmatprep.subr.bf16.mxu0 %v1194_v1  ;;  %939 = vmatpush3.bf16.msra.mxu1 %v1282_v13 }
  0x45   :  { %940 = vmatprep.subr.bf16.mxu1 %v1194_v1 }
  0x47   :  { %909 = vmatpush3.bf16.msra.mxu0 %v1065_v12 }
  0x48   :  { %914 = vmatprep.subr.bf16.mxu0 %v1194_v1  ;;  %941 = vmatpush3.bf16.msra.mxu1 %v1287_v14 }
  0x49   :  { %942 = vmatprep.subr.bf16.mxu1 %v1194_v1 }
  0x4a   :  { %911 = vmatmul.mubr.msk.bf16.vlgmr.msra.gmra.mrb[4].mxu0 %vm123_vm1, %v65_v8 }
  0x4b   :  { %915 = vmatpush3.bf16.msra.mxu0 %v1270_v9  ;;  %930 = vmatprep.mubr.msk.bf16.mxu0 %vm1195_vm0, %v1194_v1 }
  0x4c   :  { %916 = vmatprep.subr.bf16.mxu0 %v1194_v1  ;;  %943 = vmatpush3.bf16.msra.mxu1 %v1297_v15 }
  0x4d   :  { %944 = vmatprep.subr.bf16.mxu1 %v1194_v1 }
  0x4f   :  { %917 = vmatpush3.bf16.msra.mxu0 %v1276_v11 }
  0x50   :  { %918 = vmatprep.subr.bf16.mxu0 %v1194_v1  ;;  %945 = vmatpush3.bf16.msra.mxu1 %v1303_v16 }
  0x51   :  { %946 = vmatprep.subr.bf16.mxu1 %v1194_v1 }
  0x53   :  { %919 = vmatpush3.bf16.msra.mxu0 %v1282_v13 }
  0x54   :  { %920 = vmatprep.subr.bf16.mxu0 %v1194_v1  ;;  %947 = vmatpush3.bf16.msra.mxu1 %v1315_v17 }
  0x55   :  { %948 = vmatprep.subr.bf16.mxu1 %v1194_v1 }
  0x57   :  { %921 = vmatpush3.bf16.msra.mxu0 %v1287_v14 }
  0x58   :  { %922 = vmatprep.subr.bf16.mxu0 %v1194_v1  ;;  %949 = vmatpush3.bf16.msra.mxu1 %v1321_v18 }
  0x59   :  { %491 = vmatprep.subr.bf16.mxu1 %v1076_v19 }
  0x5b   :  { %923 = vmatpush3.bf16.msra.mxu0 %v1297_v15 }
  0x5c   :  { %924 = vmatprep.subr.bf16.mxu0 %v1194_v1 }
  0x5f   :  { %925 = vmatpush3.bf16.msra.mxu0 %v1303_v16 }
  0x60   :  { %926 = vmatprep.subr.bf16.mxu0 %v1194_v1 }
  0x63   :  { %927 = vmatpush3.bf16.msra.mxu0 %v1315_v17 }
  0x64   :  { %928 = vmatprep.subr.bf16.mxu0 %v1194_v1 }
  0x67   :  { %929 = vmatpush3.bf16.msra.mxu0 %v1321_v18 }
  0x68   :  { %954 = vmatprep.subr.bf16.mxu0 %v1194_v1 }
  0xb0   :  { %v455_v54 = vpop.permute.xlu0 %454 }
 0x115   :  { %v161_v27 = vpop.f32.mrb[0].mxu0 }
 0x116   :  { %v162_v28 = vadd.f32 %v161_v27, %v79_v25  ;;  %v163_v29 = vpop.f32.mrb[1].mxu0 }
 0x117   :  { %v164_v31 = vadd.f32 %v163_v29, %v83_v26  ;;  %v165_v32 = vpop.f32.mrb[2].mxu0 }
 0x118   :  { %v166_v33 = vadd.f32 %v165_v32, %v79_v25  ;;  %v167_v34 = vpop.f32.mrb[3].mxu0  ;;  %v211_v36 = vmax.f32 %v162_v28, 0.0 }
 0x119   :  { %v168_v35 = vadd.f32 %v167_v34, %v83_v26  ;;  %v212_v39 = vmax.f32 %v164_v31, 0.0 }
 0x11a   :  { %v214_v37 = vmax.f32 %v166_v33, 0.0 }
 0x11b   :  { %v215_v40 = vmax.f32 %v168_v35, 0.0 }
 0x11c   :  { %v234_v41 = vpack.c.bf16 %v214_v37, %v211_v36 }
 0x11d   :  { %v332_v43 = vpack.c.bf16 %v215_v40, %v212_v39  ;;  %v204_v45 = vpop.f32.mrb[4].mxu0 }
 0x11e   :  { %931 = vmatmul.mubr.bf16.vlgmr.msra.gmra.mrb[8].mxu0 %v234_v41  ;;  %v205_v46 = vadd.f32 %v204_v45, %v87_v38  ;;  %v912_v47 = vpop.f32.mrb[5].mxu0 }
 0x11f   :  { %955 = vmatpush3.bf16.msra.mxu0 %v1270_v9  ;;  %951 = vmatmul.mubr.bf16.vlgmr.msra.gmra.mrb[0].mxu1 %v332_v43  ;;  %v207_v48 = vpop.f32.mrb[6].mxu0 }
 0x120   :  { %492 = vmatpush1.bf16.msra.mxu1 %v1074_v42  ;;  %956 = vmatprep.subr.bf16.mxu0 %v1194_v1  ;;  %v213_v50 = vmax.f32 %v205_v46, 0.0  ;;  %v208_v51 = vadd.f32 %v207_v48, %v87_v38  ;;  %v913_v52 = vpop.f32.mrb[7].mxu0 }
 0x121   :  { %493 = vmatprep.subr.bf16.mxu1 %v1079_v44  ;;  %523 = vmatprep.mubr.bf16.mxu1 %v1193_v0  ;;  %v1406_v0 = vld [vmem:[#allocation7 + $0x70] sm:$0xff]  }
 0x122   :  { %v216_v53 = vmax.f32 %v208_v51, 0.0  ;;  %970 = vmatprep.mubr.msk.bf16.mxu0 %vm1195_vm0, %v1194_v1 }
 0x123   :  { %957 = vmatpush3.bf16.msra.mxu0 %v1276_v11 }
 0x124   :  { %494 = vmatpush1.bf16.msra.mxu1 %v1077_v49  ;;  %958 = vmatprep.subr.bf16.mxu0 %v1194_v1  ;;  %v378_v56 = vpack.c.bf16 %v216_v53, %v213_v50 }
 0x125   :  { %974 = vmatprep.subr.bf16.mxu1 %v1194_v1 }
 0x127   :  { %959 = vmatpush3.bf16.msra.mxu0 %v1282_v13  ;;  %834 = vmatmul.mubr.msk.bf16.vlgmr.msra.gmra.mrb[4].mxu1 %vm123_vm1, %v455_v54 }
 0x128   :  { %975 = vmatpush3.bf16.msra.mxu1 %v1080_v55  ;;  %960 = vmatprep.subr.bf16.mxu0 %v1194_v1 }
 0x129   :  { %976 = vmatprep.subr.bf16.mxu1 %v1194_v1  ;;  %978 = vmatprep.mubr.msk.bf16.mxu1 %vm1195_vm0, %v1194_v1 }
 0x12b   :  { %961 = vmatpush3.bf16.msra.mxu0 %v1287_v14 }
 0x12c   :  { %977 = vmatpush3.bf16.msra.mxu1 %v1081_v57  ;;  %962 = vmatprep.subr.bf16.mxu0 %v1194_v1 }
 0x12d   :  { %982 = vmatprep.subr.bf16.mxu1 %v1194_v1 }
 0x12f   :  { %963 = vmatpush3.bf16.msra.mxu0 %v1297_v15  ;;  %979 = vmatmul.mubr.msk.bf16.vlgmr.msra.gmra.mrb[8].mxu1 %vm123_vm1, %v455_v54  ;;  %v827_v15 = vld [vmem:[%s1463_s2 + $0x3] sm:$0x7] }
 0x130   :  { %964 = vmatprep.subr.bf16.mxu0 %v1194_v1  ;;  %983 = vmatpush3.bf16.msra.mxu1 %v1356_v58  ;;  %v441_v25 = vrot.slane %v827_v15, %v78_v22  ;;  %v445_v26 = vrot.slane %v827_v15, %v82_v24  ;;  %v449_v39 = vrot.slane %v827_v15, %v86_v30 }
 0x131   :  { %984 = vmatprep.subr.bf16.mxu1 %v1194_v1  ;;  %998 = vmatprep.mubr.msk.bf16.mxu1 %vm1195_vm0, %v1194_v1 }
 0x133   :  { %965 = vmatpush3.bf16.msra.mxu0 %v1303_v16 }
 0x134   :  { %966 = vmatprep.subr.bf16.mxu0 %v1194_v1  ;;  %985 = vmatpush3.bf16.msra.mxu1 %v1363_v59 }
 0x135   :  { %986 = vmatprep.subr.bf16.mxu1 %v1194_v1 }
 0x137   :  { %967 = vmatpush3.bf16.msra.mxu0 %v1315_v17 }
 0x138   :  { %968 = vmatprep.subr.bf16.mxu0 %v1194_v1  ;;  %987 = vmatpush3.bf16.msra.mxu1 %v1371_v60 }
 0x139   :  { %988 = vmatprep.subr.bf16.mxu1 %v1194_v1 }
 0x13b   :  { %969 = vmatpush3.bf16.msra.mxu0 %v1321_v18 }
 0x13c   :  { %1002 = vmatprep.subr.bf16.mxu0 %v1194_v1  ;;  %989 = vmatpush3.bf16.msra.mxu1 %v1377_v61 }
 0x13d   :  { %990 = vmatprep.subr.bf16.mxu1 %v1194_v1 }
 0x13e   :  { %971 = vmatmul.mubr.bf16.vlgmr.msra.gmra.mrb[12].mxu0 %v378_v56 }
 0x13f   :  { %1003 = vmatpush3.bf16.msra.mxu0 %v1356_v58  ;;  %1018 = vmatprep.mubr.msk.bf16.mxu0 %vm1195_vm0, %v1194_v1 }
 0x140   :  { %1004 = vmatprep.subr.bf16.mxu0 %v1194_v1  ;;  %991 = vmatpush3.bf16.msra.mxu1 %v1394_v62 }
 0x141   :  { %992 = vmatprep.subr.bf16.mxu1 %v1194_v1 }
 0x143   :  { %1005 = vmatpush3.bf16.msra.mxu0 %v1363_v59 }
 0x144   :  { %1006 = vmatprep.subr.bf16.mxu0 %v1194_v1  ;;  %993 = vmatpush3.bf16.msra.mxu1 %v1400_v63 }
 0x145   :  { %994 = vmatprep.subr.bf16.mxu1 %v1194_v1 }
 0x147   :  { %1007 = vmatpush3.bf16.msra.mxu0 %v1371_v60 }
 0x148   :  { %1008 = vmatprep.subr.bf16.mxu0 %v1194_v1  ;;  %995 = vmatpush3.bf16.msra.mxu1 %v1406_v0 }
 0x149   :  { %996 = vmatprep.subr.bf16.mxu1 %v1194_v1 }
 0x14b   :  { %1009 = vmatpush3.bf16.msra.mxu0 %v1377_v61 }
 0x14c   :  { %1010 = vmatprep.subr.bf16.mxu0 %v1194_v1  ;;  %997 = vmatpush3.bf16.msra.mxu1 %v1412_v2 }
 0x14d   :  { %1022 = vmatprep.subr.bf16.mxu1 %v1194_v1 }
 0x14f   :  { %1011 = vmatpush3.bf16.msra.mxu0 %v1394_v62 }
 0x150   :  { %1012 = vmatprep.subr.bf16.mxu0 %v1194_v1 }
 0x153   :  { %1013 = vmatpush3.bf16.msra.mxu0 %v1400_v63 }
 0x154   :  { %1014 = vmatprep.subr.bf16.mxu0 %v1194_v1 }
 0x157   :  { %1015 = vmatpush3.bf16.msra.mxu0 %v1406_v0 }
 0x158   :  { %1016 = vmatprep.subr.bf16.mxu0 %v1194_v1 }
 0x15b   :  { %1017 = vmatpush3.bf16.msra.mxu0 %v1412_v2 }
 0x1f1   :  { %v323_v4 = vpop.f32.mrb[8].mxu0 }
 0x1f2   :  { %v324_v5 = vadd.f32 %v818_v3, %v323_v4  ;;  %v932_v6 = vpop.f32.mrb[9].mxu0  ;;  %v367_v7 = vpop.f32.mrb[0].mxu1 }
 0x1f3   :  { %v368_v8 = vadd.f32 %v818_v3, %v367_v7  ;;  %v326_v9 = vpop.f32.mrb[10].mxu0  ;;  %v952_v10 = vpop.f32.mrb[1].mxu1 }
 0x1f4   :  { %v330_v11 = vmax.f32 %v324_v5, 0.0  ;;  %v327_v12 = vadd.f32 %v818_v3, %v326_v9  ;;  %v933_v13 = vpop.f32.mrb[11].mxu0  ;;  %v370_v14 = vpop.f32.mrb[2].mxu1 }
 0x1f5   :  { %v374_v16 = vmax.f32 %v368_v8, 0.0  ;;  %v371_v17 = vadd.f32 %v818_v3, %v370_v14  ;;  %v953_v18 = vpop.f32.mrb[3].mxu1 }
 0x1f6   :  { %v331_v19 = vmax.f32 %v327_v12, 0.0 }
 0x1f7   :  { %v376_v20 = vadd.f32 %v374_v16, %v330_v11  ;;  %v375_v23 = vmax.f32 %v371_v17, 0.0 }
 0x1f9   :  { %v377_v27 = vadd.f32 %v375_v23, %v331_v19 }
 0x1fa   :  { %v525_v28 = vpop.f32.mrb[4].mxu1 }
 0x1fb   :  { %v526_v29 = vadd.f32 %v525_v28, %v441_v25  ;;  %v527_v31 = vpop.f32.mrb[5].mxu1 }
 0x1fc   :  { %v528_v32 = vadd.f32 %v527_v31, %v445_v26  ;;  %v529_v33 = vpop.f32.mrb[6].mxu1 }
 0x1fd   :  { %v530_v34 = vadd.f32 %v529_v33, %v441_v25  ;;  %v531_v35 = vpop.f32.mrb[7].mxu1  ;;  %v575_v37 = vmax.f32 %v526_v29, 0.0 }
 0x1fe   :  { %v532_v36 = vadd.f32 %v531_v35, %v445_v26  ;;  %v576_v40 = vmax.f32 %v528_v32, 0.0 }
 0x1ff   :  { %v578_v38 = vmax.f32 %v530_v34, 0.0 }
 0x200   :  { %v579_v41 = vmax.f32 %v532_v36, 0.0 }
 0x201   :  { %v600_v22 = vpack.c.bf16 %v578_v38, %v575_v37 }
 0x202   :  { %v698_v42 = vpack.c.bf16 %v579_v41, %v576_v40  ;;  %v568_v43 = vpop.f32.mrb[8].mxu1 }
 0x203   :  { %v569_v24 = vadd.f32 %v568_v43, %v449_v39  ;;  %v980_v44 = vpop.f32.mrb[9].mxu1  ;;  %999 = vmatmul.mubr.bf16.vlgmr.msra.gmra.mrb[12].mxu1 %v600_v22 }
 0x204   :  { %1023 = vmatpush3.bf16.msra.mxu1 %v1356_v58  ;;  %v571_v45 = vpop.f32.mrb[10].mxu1  ;;  %1019 = vmatmul.mubr.bf16.vlgmr.msra.gmra.mrb[16].mxu0 %v698_v42 }
 0x205   :  { %v572_v46 = vadd.f32 %v571_v45, %v449_v39  ;;  %v981_v47 = vpop.f32.mrb[11].mxu1  ;;  %1024 = vmatprep.subr.bf16.mxu1 %v1194_v1  ;;  %1038 = vmatprep.mubr.msk.bf16.mxu1 %vm1195_vm0, %v1194_v1  ;;  %v577_v21 = vmax.f32 %v569_v24, 0.0 }
 0x207   :  { %v580_v30 = vmax.f32 %v572_v46, 0.0 }
 0x208   :  { %1025 = vmatpush3.bf16.msra.mxu1 %v1363_v59  ;;  %v837_v59 = vld [vmem:[%s1465_s4 + $0x1] ss:$0 sm:$0xff]  ;;  %s1197_s4 = smov [#allocation8]  }
 0x209   :  { %v744_v48 = vpack.c.bf16 %v580_v30, %v577_v21  ;;  %1026 = vmatprep.subr.bf16.mxu1 %v1194_v1  ;;  %s797_s15 = sshll.u32 %s1197_s4, 4  ;;  %s798_s15 = int_to_ptr.vmem [resolvable:$true] %s797_s15 }
 0x20a   :  { %s1156_s16 = scalar_lea.vmem %s798_s15, 512  ;;  %p1161_p11 = scmp.lt.s32.totalorder %s798_s15, %s798_s15 }
 0x20b   :  { %p1157_p10 = scmp.ne.s32.totalorder %s798_s15, %s1156_s16  ;;  %p1162_p12 = scmp.lt.s32.totalorder %s1156_s16, %s1156_s16 }
 0x20c   :  { %1027 = vmatpush3.bf16.msra.mxu1 %v1371_v60 }
 0x20d   :  { %1028 = vmatprep.subr.bf16.mxu1 %v1194_v1  ;;  %p1163_p13 = por %p1162_p12, %p1161_p11 }
 0x20f   :  { %p1164_p0 = pnand %p1163_p13, %p1157_p10 }
 0x210   :  { %1029 = vmatpush3.bf16.msra.mxu1 %v1377_v61 }
 0x211   :  { %v413_v49 = vpop.f32.mrb[12].mxu0  ;;  %1030 = vmatprep.subr.bf16.mxu1 %v1194_v1 }
 0x212   :  { %v414_v50 = vadd.f32 %v818_v3, %v413_v49  ;;  %v972_v51 = vpop.f32.mrb[13].mxu0 }
 0x213   :  { %v416_v52 = vpop.f32.mrb[14].mxu0 }
 0x214   :  { %v420_v53 = vmax.f32 %v414_v50, 0.0  ;;  %v417_v54 = vadd.f32 %v818_v3, %v416_v52  ;;  %1031 = vmatpush3.bf16.msra.mxu1 %v1394_v62  ;;  %v973_v55 = vpop.f32.mrb[15].mxu0 }
 0x215   :  { %1032 = vmatprep.subr.bf16.mxu1 %v1194_v1 }
 0x216   :  { %v422_v56 = vadd.f32 %v420_v53, %v376_v20  ;;  %v421_v57 = vmax.f32 %v417_v54, 0.0 }
 0x218   :  { %424 = vst [vmem:[#allocation8] sm:$0xff] %v422_v56  ;;  %v423_v58 = vadd.f32 %v421_v57, %v377_v27  ;;  %1033 = vmatpush3.bf16.msra.mxu1 %v1400_v63 }
 0x219   :  { %1034 = vmatprep.subr.bf16.mxu1 %v1194_v1 }
 0x21a   :  { %425 = vst [vmem:[#allocation8 + $0x10] sm:$0xff] %v423_v58 }
 0x21c   :  { %1035 = vmatpush3.bf16.msra.mxu1 %v1406_v0 }
 0x21d   :  { %1036 = vmatprep.subr.bf16.mxu1 %v1194_v1 }
 0x220   :  { %1037 = vmatpush3.bf16.msra.mxu1 %v1412_v2 }
 0x223   :  { %1039 = vmatmul.mubr.bf16.vlgmr.msra.gmra.mrb[16].mxu1 %v744_v48 }
 0x2d6   :  { %v689_v60 = vpop.f32.mrb[12].mxu1 }
 0x2d7   :  { %v690_v61 = vadd.f32 %v837_v59, %v689_v60  ;;  %v1000_v62 = vpop.f32.mrb[13].mxu1  ;;  %v733_v3 = vpop.f32.mrb[16].mxu0 }
 0x2d8   :  { %v734_v4 = vadd.f32 %v837_v59, %v733_v3  ;;  %v692_v63 = vpop.f32.mrb[14].mxu1  ;;  %v1020_v5 = vpop.f32.mrb[17].mxu0 }
 0x2d9   :  { %v696_v6 = vmax.f32 %v690_v61, 0.0  ;;  %v693_v7 = vadd.f32 %v837_v59, %v692_v63  ;;  %v1001_v8 = vpop.f32.mrb[15].mxu1  ;;  %v736_v0 = vpop.f32.mrb[18].mxu0 }
 0x2da   :  { %v740_v9 = vmax.f32 %v734_v4, 0.0  ;;  %v737_v1 = vadd.f32 %v837_v59, %v736_v0  ;;  %v1021_v10 = vpop.f32.mrb[19].mxu0 }
 0x2db   :  { %v697_v2 = vmax.f32 %v693_v7, 0.0 }
 0x2dc   :  { %v742_v11 = vadd.f32 %v740_v9, %v696_v6  ;;  %v741_v12 = vmax.f32 %v737_v1, 0.0 }
 0x2de   :  { %v743_v13 = vadd.f32 %v741_v12, %v697_v2 }
 0x2f6   :  { %v779_v14 = vpop.f32.mrb[16].mxu1 }
 0x2f7   :  { %v780_v15 = vadd.f32 %v837_v59, %v779_v14  ;;  %v1040_v16 = vpop.f32.mrb[17].mxu1 }
 0x2f8   :  { %v782_v17 = vpop.f32.mrb[18].mxu1 }
 0x2f9   :  { %v786_v18 = vmax.f32 %v780_v15, 0.0  ;;  %v783_v19 = vadd.f32 %v837_v59, %v782_v17  ;;  %v1041_v20 = vpop.f32.mrb[19].mxu1 }
 0x2fb   :  { %v788_v23 = vadd.f32 %v786_v18, %v742_v11  ;;  %v787_v25 = vmax.f32 %v783_v19, 0.0 }
 0x2fd   :  { %790 = vst [vmem:[#allocation8 + $0x8] sm:$0xff] %v788_v23  ;;  %v789_v26 = vadd.f32 %v787_v25, %v743_v13 }
 0x2ff   :  { %791 = vst [vmem:[#allocation8 + $0x18] sm:$0xff] %v789_v26 }
 0x300   :  { %1167 = shalt.err (!%p1164_p0)
}
 0x301   :  { %s1168_s18 = scalar_lea.hbm %s1466_s5, 512 }
 0x302   :  { %p1169_p1 = scmp.ne.s32.totalorder %s1466_s5, %s1168_s18  ;;  %p1172_p2 = scmp.lt.u32.totalorder %s1168_s18, %s1466_s5 }
 0x304   :  { %p1174_p3 = pnand %p1172_p2, %p1169_p1 }
 0x306   :  { %1177 = shalt.err (!%p1174_p3)
}
 0x307   :  { %s1198_s23 = smov 256   ;;  %s1199_s24 = smov 16  }
 0x308   :  { %803 = dma.vmem_to_hbm [thread:$0]  %s798_s15, 512, %s1466_s5, [#allocation4], %s1198_s23, %s1198_s23, %s1199_s24  }
 0x309   :  { %1182 = dma.done.wait [#allocation4], 512  }
 0x30a   :  { %1183 = vsyncadd [#allocation4], 4294966784 }
 0x30b   :  { %807 = vsyncpa [#allocation3], 1 }
 0x30c   :  { %808 = vsyncpa [#allocation6], 1 }
 0x30d   :  { %809 = vsyncpa [#allocation4], 1 }

</bundles_post_ra>
